<compile_context>
chip_gen: v7x
topology: tpu7x:2x2x1
jax: 0.10.0
libtpu: 0.0.40
codegen_flags: <defaults>
</compile_context>

<pallas_src>
import jax
import jax.numpy as jnp
from jax.experimental import pallas as pl
from jax.experimental.pallas import tpu as pltpu


_VMEM_LIMIT_BYTES = 48 * 1024 * 1024      # per-TC scoped VMEM we request
_LANE = 128
_SUBLANE = 8


def _round_up(n, m):
    return ((n + m - 1) // m) * m


def _logreg_kernel(x_ref, w_ref, b_ref, o_ref):
    # x_ref: (TB, D) VMEM (streamed, native dtype), w_ref: (1, D) VMEM
    # (resident across the grid), b_ref: (1, 1) SMEM scalar, o_ref: (TB, 1) f32.
    x = x_ref[...].astype(jnp.float32)        # cast in-kernel (VPU), not in HBM
    w = w_ref[...].astype(jnp.float32)        # (1, D), broadcasts over TB rows
    xw = x * w                                # VPU elementwise

    d = xw.shape[1]
    if d > _LANE:
        # Chunked pre-reduction: accumulate vreg-aligned 128-lane slices with
        # VPU adds (no relayout: slices fall on vreg boundaries), then do a
        # single cross-lane reduce on the (TB, 128) partial.  Cuts XLU work by
        # ~D/128x so HBM stays the binding unit on v6e/v7x.
        nfull = d // _LANE
        acc = xw[:, :_LANE]
        for c in range(1, nfull):
            acc = acc + xw[:, c * _LANE:(c + 1) * _LANE]
        logits = jnp.sum(acc, axis=1, keepdims=True)
        if d % _LANE:
            logits = logits + jnp.sum(xw[:, nfull * _LANE:], axis=1,
                                      keepdims=True)
    else:
        logits = jnp.sum(xw, axis=1, keepdims=True)

    logits = logits + b_ref[0, 0]
    o_ref[...] = jax.nn.sigmoid(logits).astype(o_ref.dtype)   # EUP sigmoid


def _choose_batch_tile(batch, input_dim, x_itemsize):
    """Pick the batch tile against the real (lane-padded) VMEM footprint."""
    d_pad = _round_up(max(input_dim, 1), _LANE)
    x_row_bytes = d_pad * x_itemsize          # one x row as it sits in VMEM
    out_row_bytes = _LANE * 4                 # (tb,1) f32 block pads to 128 lanes

    # Target ~8 MiB of VMEM-resident x per buffer: per-step overhead (~0.35 us)
    # stays <~12% even at v7x's ~3.2 TB/s per-TC HBM (<~5% on v6e, <~3% on v5e),
    # while 2 x-buffers + 2 out-buffers + weight stay well under the 48 MiB
    # scoped limit we request (per-TC on v7x; v5e/v6e have far more physical VMEM).
    target_x_bytes = 8 * 1024 * 1024
    budget = _VMEM_LIMIT_BYTES - 4 * 1024 * 1024   # slack for weight/misc/scalars

    tb = target_x_bytes // x_row_bytes
    per_row = 2 * (x_row_bytes + out_row_bytes)    # double-buffered x + out
    tb = min(tb, budget // per_row)
    tb = min(tb, _round_up(batch, _SUBLANE))
    tb = max(_SUBLANE, (tb // _SUBLANE) * _SUBLANE)
    return int(tb)


def logistic_regression_forward(x, weight, bias):
    """sigmoid(x @ weight.T + bias), matching torch.sigmoid(nn.Linear(D, 1)(x))."""
    B, D = x.shape
    tb = _choose_batch_tile(B, D, jnp.dtype(x.dtype).itemsize)
    num_tiles = pl.cdiv(B, tb)
    B_pad = num_tiles * tb                     # output padded to the grid; x is NOT padded

    b_smem = bias.reshape(1, 1).astype(jnp.float32)

    out = pl.pallas_call(
        _logreg_kernel,
        out_shape=jax.ShapeDtypeStruct((B_pad, 1), jnp.float32),
        grid_spec=pltpu.PrefetchScalarGridSpec(
            num_scalar_prefetch=0,
            grid=(num_tiles,),                                  # stream over batch
            in_specs=[
                pl.BlockSpec((tb, D), lambda i: (i, 0)),        # x: pipelined tiles (tail over-reads)
                pl.BlockSpec((1, D), lambda i: (0, 0)),         # weight: VMEM-resident
                pl.BlockSpec(memory_space=pltpu.SMEM),          # bias scalar
            ],
            out_specs=pl.BlockSpec((tb, 1), lambda i: (i, 0)),
        ),
        compiler_params=pltpu.CompilerParams(
            dimension_semantics=("parallel",),                  # megacore-shard batch (v7x: 2 TCs)
            vmem_limit_bytes=_VMEM_LIMIT_BYTES,
        ),
        cost_estimate=pl.CostEstimate(
            flops=2 * B * D,
            transcendentals=B_pad,
            bytes_accessed=B * D * jnp.dtype(x.dtype).itemsize
            + D * jnp.dtype(weight.dtype).itemsize
            + B_pad * 4,
        ),
    )(x, weight, b_smem)

    # Garbage rows from the tail over-read only land at rows >= B; slice them off.
    return out[:B]


# TODO(synk): fit() (BCELoss + SGD training loop) and predict() thresholding are
# host-side training utilities, not part of the forward pass; only forward is kerneled.

if __name__ == "__main__":
    key = jax.random.PRNGKey(0)

    def run_case(key, batch, input_dim):
        kx, kw, kb = jax.random.split(key, 3)
        x = jax.random.normal(kx, (batch, input_dim), dtype=jnp.float32)
        bound = 1.0 / jnp.sqrt(jnp.float32(input_dim))
        weight = jax.random.uniform(kw, (1, input_dim), minval=-bound,
                                    maxval=bound, dtype=jnp.float32)
        bias = jax.random.uniform(kb, (1,), minval=-bound, maxval=bound,
                                  dtype=jnp.float32)

        out = logistic_regression_forward(x, weight, bias)
        out = jax.block_until_ready(out)

        # Reference (mathematically identical to x @ weight.T + bias, kept on
        # the exact-f32 VPU path so tolerances stay tight).
        ref = jax.nn.sigmoid(jnp.sum(x * weight, axis=-1, keepdims=True) + bias)
        assert out.shape == (batch, 1)
        assert jnp.allclose(out, ref, atol=1e-6, rtol=1e-6)

    k1, k2 = jax.random.split(key)
    run_case(k1, batch=8, input_dim=32)     # demo shape from the module
    run_case(k2, batch=37, input_dim=384)   # ragged batch + chunked-reduce path
    print("KERNEL_OK")
</pallas_src>

<mosaic_0001>
module attributes {stable_mosaic.version = 11 : i64} {
  func.func @_logreg_kernel(%arg0: i32, %arg1: memref<8x32xf32, #tpu.memory_space<vmem>>, %arg2: memref<1x32xf32, #tpu.memory_space<vmem>>, %arg3: memref<1x1xf32, #tpu.memory_space<smem>>, %arg4: memref<8x1xf32, #tpu.memory_space<vmem>>) attributes {dimension_semantics = [#tpu.dimension_semantics<parallel>], iteration_bounds = array<i64: 1>, scalar_prefetch = 0 : i64, scratch_operands = 0 : i64, tpu.core_type = #tpu.core_type<tc>, window_params = [{transform_indices = @transform_0, window_bounds = array<i64: 8, 32>}, {pipeline_mode = #tpu.pipeline_mode<synchronous>, transform_indices = @transform_1, window_bounds = array<i64: 1, 32>}, {transform_indices = @transform_2, window_bounds = array<i64: 1, 1>}, {transform_indices = @transform_3, window_bounds = array<i64: 8, 1>}]} {
    %c0 = arith.constant 0 : index
    %c0_0 = arith.constant 0 : index
    %0 = vector.load %arg1[%c0, %c0_0] : memref<8x32xf32, #tpu.memory_space<vmem>>, vector<8x32xf32>
    %c0_1 = arith.constant 0 : index
    %c0_2 = arith.constant 0 : index
    %1 = vector.load %arg2[%c0_1, %c0_2] : memref<1x32xf32, #tpu.memory_space<vmem>>, vector<1x32xf32>
    %2 = vector.broadcast %1 : vector<1x32xf32> to vector<8x32xf32>
    %3 = arith.mulf %0, %2 : vector<8x32xf32>
    %cst = arith.constant dense<0.000000e+00> : vector<8xf32>
    %4 = vector.multi_reduction <add>, %3, %cst [1] : vector<8x32xf32> to vector<8xf32>
    %5 = vector.shape_cast %4 : vector<8xf32> to vector<8x1xf32>
    %c0_3 = arith.constant 0 : index
    %c0_4 = arith.constant 0 : index
    %6 = memref.load %arg3[%c0_3, %c0_4] : memref<1x1xf32, #tpu.memory_space<smem>>
    %7 = vector.broadcast %6 : f32 to vector<8x1xf32>
    %8 = arith.addf %5, %7 : vector<8x1xf32>
    %9 = arith.negf %8 : vector<8x1xf32>
    %10 = math.exp %9 : vector<8x1xf32>
    %cst_5 = arith.constant 1.000000e+00 : f32
    %11 = vector.broadcast %cst_5 : f32 to vector<8x1xf32>
    %12 = arith.addf %11, %10 : vector<8x1xf32>
    %13 = arith.divf %11, %12 : vector<8x1xf32>
    %c0_6 = arith.constant 0 : index
    %c0_7 = arith.constant 0 : index
    %14 = vector.load %arg4[%c0_6, %c0_7] : memref<8x1xf32, #tpu.memory_space<vmem>>, vector<8x1xf32>
    tpu.vector_store %arg4[%c0_6, %c0_7], %13 {strides = array<i32>} : memref<8x1xf32, #tpu.memory_space<vmem>>, vector<8x1xf32>,
    return
  }
  func.func @transform_0(%arg0: i32) -> (i32, i32) {
    %c0_i32 = arith.constant 0 : i32
    %c0_i32_0 = arith.constant 0 : i32
    return %arg0, %c0_i32 : i32, i32
  }
  func.func @transform_1(%arg0: i32) -> (i32, i32) {
    %c0_i32 = arith.constant 0 : i32
    %c0_i32_0 = arith.constant 0 : i32
    %c0_i32_1 = arith.constant 0 : i32
    return %c0_i32, %c0_i32_0 : i32, i32
  }
  func.func @transform_2(%arg0: i32) -> (i32, i32) {
    %c0_i32 = arith.constant 0 : i32
    %c0_i32_0 = arith.constant 0 : i32
    %c0_i32_1 = arith.constant 0 : i32
    return %c0_i32, %c0_i32_0 : i32, i32
  }
  func.func @transform_3(%arg0: i32) -> (i32, i32) {
    %c0_i32 = arith.constant 0 : i32
    %c0_i32_0 = arith.constant 0 : i32
    return %arg0, %c0_i32 : i32, i32
  }
}

</mosaic_0001>

<bundles_post_ra>
// kernel: tpu_custom_call.1
= control target key start
LH: loop header
LB: loop body
LE: loop exit
PB: predicated region body
PF: predicated region fallthrough
CT: control target
= control target key end

     0   :  { %9 = vsyncpa [#allocation4], 0  ;;  %s87_s12 = smov [#allocation3]   ;;  %s129_s0 = inlined_call_operand.hbm [shape: f32[8,32], index: 0, kind: input, shape index: {}]   ;;  %s130_s1 = inlined_call_operand.vmem [shape: f32[1,32], index: 1, kind: input, shape index: {}]   ;;  %s131_s2 = inlined_call_operand.<no memory space> [shape: f32[1,1], index: 2, kind: input, shape index: {}]   ;;  %s132_s3 = inlined_call_operand.vmem [shape: f32[8,1], index: 3, kind: output, shape index: {}]  }
   0x1   :  { %s16_s13 = sshll.u32 %s87_s12, 4  ;;  %s63_s16 = scalar_lea.hbm %s129_s0, 128  ;;  %s17_s13 = int_to_ptr.vmem [resolvable:$true] %s16_s13 }
   0x2   :  { %p64_p0 = scmp.ne.s32.totalorder %s129_s0, %s63_s16  ;;  %p67_p1 = scmp.lt.u32.totalorder %s63_s16, %s129_s0 }
   0x4   :  { %p69_p2 = pnand %p67_p1, %p64_p0 }
   0x6   :  { %72 = shalt.err (!%p69_p2)
}
   0x7   :  { %s73_s21 = scalar_lea.vmem %s17_s13, 128  ;;  %p78_p4 = scmp.lt.s32.totalorder %s17_s13, %s17_s13 }
   0x8   :  { %p74_p3 = scmp.ne.s32.totalorder %s17_s13, %s73_s21  ;;  %p79_p5 = scmp.lt.s32.totalorder %s73_s21, %s73_s21 }
   0xa   :  { %p80_p6 = por %p79_p5, %p78_p4 }
   0xc   :  { %p81_p7 = pnand %p80_p6, %p74_p3 }
   0xe   :  { %84 = shalt.err (!%p81_p7)
}
   0xf   :  { %19 = dma.hbm_to_vmem [thread:$0]  %s129_s0, 128, %s17_s13, [#allocation4]  }
  0x10   :  { %85 = dma.done.wait [#allocation4], 128  }
  0x11   :  { %86 = vsyncadd [#allocation4], 4294967168  ;;  %v27_v0 = vld [vmem:[#allocation3] sm:$0xff]  ;;  %vm36_vm0 = vcmask 261120   ;;  %v41_v4 = vstv %s131_s2  ;;  %vm49_vm1 = vcmask 7168  }
  0x12   :  { %v56_v1 = vld [vmem:[%s130_s1] ss:$0 sm:$0xff] }
  0x13   :  { %v35_v2 = vmul.f32 %v56_v1, %v27_v0 }
  0x15   :  { %v37_v3 = vsel %vm36_vm0, %v35_v2, 0.0 }
  0x16   :  { %38 = vadd.xlane.f32.xlu0 %v37_v3 }
  0xa3   :  { %v39_v5 = vpop.xlane.xlu0 %38 }
  0xa4   :  { %v42_v6 = vadd.f32 %v41_v4, %v39_v5 }
  0xa6   :  { %v57_v7 = vmul.f32 -1.442695, %v42_v6 }
  0xa8   :  { %59 = vpow2.f32 %v57_v7 }
  0xb2   :  { %v60_v8 = vpop.eup %59 }
  0xb3   :  { %v46_v9 = vadd.f32 1.0, %v60_v8 }
  0xb5   :  { %61 = vrcp.f32 %v46_v9 }
  0xbf   :  { %v62_v10 = vpop.eup %61 }
  0xc0   :  { %50 = vst.msk [vmem:[%s132_s3] sm:$0xff] %vm49_vm1, %v62_v10 }
  0xc1   :  { %55 = vsyncpa [#allocation4], 1 }

</bundles_post_ra>
